<compile_context>
chip_gen: v6e
topology: v6e:2x2x1
jax: 0.10.0
libtpu: 0.0.40
codegen_flags: <defaults>
</compile_context>

<pallas_src>
import functools

import jax
import jax.numpy as jnp
import numpy as np
from jax.experimental import pallas as pl
from jax.experimental.pallas import tpu as pltpu

W_FOCAL, W_DICE, W_IOU = 20.0, 1.0, 1.0
F_ALPHA, F_GAMMA = 0.25, 2           # gamma stays a Python int -> exact VPU square
LANES = 128                          # vreg lane width
MAX_TR = 4096                        # max tile rows (4096*128*4B = 2 MiB per input buffer)
_PAD_LOGIT = -100.0                  # padding that contributes exactly 0 to every sum


def _ceil_div(a, b):
    return -(-a // b)


def _loss_kernel(logits_ref, targets_ref,
                 focal_ref, inter_ref, ptsum_ref, areai_ref, areau_ref,
                 *, alpha, gamma):
    c = pl.program_id(1)             # spatial-chunk index (reduction axis)

    # Cast to f32 *after* the tile is in vregs (inputs may be bf16 etc.).
    x = logits_ref[0].astype(jnp.float32)    # (TR, 128)
    t = targets_ref[0].astype(jnp.float32)   # (TR, 128), binary {0, 1}

    # --- shared transcendentals: one exp, one log1p, one reciprocal per element ---
    e = jnp.exp(-jnp.abs(x))
    softplus = jnp.log1p(e)                      # log(1 + exp(-|x|))
    inv = 1.0 / (1.0 + e)
    p = jnp.where(x >= 0.0, inv, e * inv)        # sigmoid(x)

    tb = t > 0.0                                 # binary target mask (bool)

    # --- sigmoid focal loss (stable BCE-with-logits) ---
    ce = jnp.maximum(x, 0.0) - x * t + softplus
    one_m_pt = jnp.where(tb, 1.0 - p, p)         # 1 - p_t   (t is binary)
    alpha_t = jnp.where(tb, alpha, 1.0 - alpha)
    fl = alpha_t * ce * one_m_pt ** gamma        # gamma == 2 -> single multiply

    # --- dice / IoU building blocks (t is binary: gt-mask == t) ---
    pm = (x > 0.0).astype(jnp.float32)           # thresholded predicted mask

    def csum(v):
        # (TR,128) -> (1,1,128): sublane-axis sum first (VPU vreg adds + one XLU
        # sublane reduce). The final 128-lane reduce happens in the wrapper.
        return jnp.sum(v, axis=0, keepdims=True)[None]

    @pl.when(c == 0)
    def _():
        for r in (focal_ref, inter_ref, ptsum_ref, areai_ref, areau_ref):
            r[...] = jnp.zeros_like(r)

    focal_ref[...] += csum(fl)                   # sum of focal terms
    inter_ref[...] += csum(p * t)                # sum(p * t)
    ptsum_ref[...] += csum(p + t)                # sum(p) + sum(t), fused
    areai_ref[...] += csum(pm * t)               # |pred AND gt|
    areau_ref[...] += csum(jnp.maximum(pm, t))   # |pred OR  gt|


def focal_dice_iou_loss(mask_logits, targets, iou_predictions):
    """mask_logits, targets: [B, H, W]; iou_predictions: [B, 1] (or [B]).
    Returns (total, loss_dict). Inputs may be bf16/f32; no wrapper up-cast."""
    B, H, W = mask_logits.shape
    HW = H * W

    # Lane-dense layout: flatten spatial dims to [B, R, 128], tiled as (1, TR, 128).
    # TR is (8,128)-aligned, <= MAX_TR, with near-minimal padding rows.
    R0 = _ceil_div(HW, LANES)
    NC = _ceil_div(R0, MAX_TR)
    TR = _ceil_div(_ceil_div(R0, NC), 8) * 8
    R = NC * TR
    pad = R * LANES - HW

    xf = mask_logits.reshape(B, HW)
    tf = targets.reshape(B, HW)
    if pad:
        # Padding contributes exactly zero to focal/dice/IoU partial sums.
        xf = jnp.pad(xf, ((0, 0), (0, pad)), constant_values=_PAD_LOGIT)
        tf = jnp.pad(tf, ((0, 0), (0, pad)), constant_values=0.0)
    xf = xf.reshape(B, R, LANES)
    tf = tf.reshape(B, R, LANES)

    kernel = functools.partial(_loss_kernel, alpha=F_ALPHA, gamma=F_GAMMA)

    part_shape = jax.ShapeDtypeStruct((B, 1, LANES), jnp.float32)
    part_spec = pl.BlockSpec((1, 1, LANES), lambda b, c: (b, 0, 0))

    partials = pl.pallas_call(
        kernel,
        out_shape=(part_shape,) * 5,
        grid_spec=pltpu.PrefetchScalarGridSpec(
            num_scalar_prefetch=0,
            grid=(B, NC),
            in_specs=[
                pl.BlockSpec((1, TR, LANES), lambda b, c: (b, c, 0)),   # logits tile
                pl.BlockSpec((1, TR, LANES), lambda b, c: (b, c, 0)),   # targets tile
            ],
            out_specs=[part_spec] * 5,
        ),
        compiler_params=pltpu.CompilerParams(
            dimension_semantics=("parallel", "arbitrary"),  # batch parallel (2 TCs on v7x)
            vmem_limit_bytes=32 * 1024 * 1024,
        ),
    )(xf, tf)

    # Trivial O(B*128) final combine in the wrapper.
    focal_p, inter_p, ptsum_p, areai_p, areau_p = partials
    inter = jnp.sum(inter_p, axis=(1, 2))
    ptsum = jnp.sum(ptsum_p, axis=(1, 2))
    area_i = jnp.sum(areai_p, axis=(1, 2))
    area_u = jnp.sum(areau_p, axis=(1, 2))

    focal = jnp.sum(focal_p) / float(H * B)
    dice = jnp.sum(1.0 - (2.0 * inter + 1.0) / (ptsum + 1.0)) / float(B)
    actual_iou = area_i / jnp.maximum(area_u, 1.0)
    pred_iou = jnp.asarray(iou_predictions, jnp.float32).reshape(B)
    iou = jnp.sum((pred_iou - actual_iou) ** 2) / float(B)

    total = W_FOCAL * focal + W_DICE * dice + W_IOU * iou
    loss_dict = {"total_loss": total, "focal_loss": focal,
                 "dice_loss": dice, "iou_loss": iou}
    return total, loss_dict


def _reference(mask_logits, targets, iou_predictions):
    """Plain-JAX f32 reference mirroring the PyTorch semantics."""
    B, H, W = mask_logits.shape
    x = mask_logits.astype(jnp.float32)
    t = targets.astype(jnp.float32)
    p = jax.nn.sigmoid(x)
    ce = jnp.maximum(x, 0.0) - x * t + jnp.log1p(jnp.exp(-jnp.abs(x)))
    p_t = p * t + (1.0 - p) * (1.0 - t)
    fl = ce * (1.0 - p_t) ** F_GAMMA
    alpha_t = F_ALPHA * t + (1.0 - F_ALPHA) * (1.0 - t)
    fl = alpha_t * fl
    focal = jnp.sum(fl) / (H * B)

    pf = p.reshape(B, -1)
    tf = t.reshape(B, -1)
    num = 2.0 * jnp.sum(pf * tf, axis=-1)
    den = jnp.sum(pf, axis=-1) + jnp.sum(tf, axis=-1)
    dice = jnp.sum(1.0 - (num + 1.0) / (den + 1.0)) / B

    pm = x.reshape(B, -1) > 0
    gm = t.reshape(B, -1) > 0
    ai = jnp.sum(pm & gm, axis=-1).astype(jnp.float32)
    au = jnp.sum(pm | gm, axis=-1).astype(jnp.float32)
    actual = ai / jnp.maximum(au, 1.0)
    iou = jnp.sum((jnp.asarray(iou_predictions, jnp.float32).reshape(B) - actual) ** 2) / B

    total = W_FOCAL * focal + W_DICE * dice + W_IOU * iou
    return total, focal, dice, iou


if __name__ == "__main__":
    key = jax.random.PRNGKey(0)
    k1, k2, k3 = jax.random.split(key, 3)

    B, H, W = 2, 16, 16
    mask_logits = jax.random.normal(k1, (B, H, W), dtype=jnp.float32) * 2.0
    targets = jax.random.bernoulli(k2, p=0.4, shape=(B, H, W)).astype(jnp.float32)
    iou_predictions = jax.random.uniform(k3, (B, 1), dtype=jnp.float32)

    # f32 path vs reference
    total, loss_dict = focal_dice_iou_loss(mask_logits, targets, iou_predictions)
    jax.block_until_ready(total)

    ref_total, ref_focal, ref_dice, ref_iou = _reference(mask_logits, targets, iou_predictions)
    np.testing.assert_allclose(np.asarray(total), np.asarray(ref_total), rtol=1e-5, atol=1e-5)
    np.testing.assert_allclose(np.asarray(loss_dict["focal_loss"]), np.asarray(ref_focal), rtol=1e-5, atol=1e-5)
    np.testing.assert_allclose(np.asarray(loss_dict["dice_loss"]), np.asarray(ref_dice), rtol=1e-5, atol=1e-5)
    np.testing.assert_allclose(np.asarray(loss_dict["iou_loss"]), np.asarray(ref_iou), rtol=1e-5, atol=1e-5)

    # bf16 inputs go straight into the kernel (no wrapper up-cast); compare against
    # an f32 reference evaluated on the same bf16-rounded values.
    x_bf = mask_logits.astype(jnp.bfloat16)
    t_bf = targets.astype(jnp.bfloat16)
    total_bf, _ = focal_dice_iou_loss(x_bf, t_bf, iou_predictions)
    jax.block_until_ready(total_bf)
    ref_bf_total, _, _, _ = _reference(x_bf.astype(jnp.float32),
                                       t_bf.astype(jnp.float32), iou_predictions)
    np.testing.assert_allclose(np.asarray(total_bf), np.asarray(ref_bf_total), rtol=1e-4, atol=1e-4)

    print("KERNEL_OK")
</pallas_src>

<mosaic_0001>
module attributes {stable_mosaic.version = 11 : i64} {
  func.func @_loss_kernel(%arg0: i32, %arg1: i32, %arg2: memref<1x8x128xf32, #tpu.memory_space<vmem>>, %arg3: memref<1x8x128xf32, #tpu.memory_space<vmem>>, %arg4: memref<1x1x128xf32, #tpu.memory_space<vmem>>, %arg5: memref<1x1x128xf32, #tpu.memory_space<vmem>>, %arg6: memref<1x1x128xf32, #tpu.memory_space<vmem>>, %arg7: memref<1x1x128xf32, #tpu.memory_space<vmem>>, %arg8: memref<1x1x128xf32, #tpu.memory_space<vmem>>) attributes {dimension_semantics = [#tpu.dimension_semantics<parallel>, #tpu.dimension_semantics<arbitrary>], iteration_bounds = array<i64: 2, 1>, scalar_prefetch = 0 : i64, scratch_operands = 0 : i64, tpu.core_type = #tpu.core_type<tc>, window_params = [{transform_indices = @transform_0, window_bounds = array<i64: 1, 8, 128>}, {transform_indices = @transform_1, window_bounds = array<i64: 1, 8, 128>}, {transform_indices = @transform_2, window_bounds = array<i64: 1, 1, 128>}, {transform_indices = @transform_3, window_bounds = array<i64: 1, 1, 128>}, {transform_indices = @transform_4, window_bounds = array<i64: 1, 1, 128>}, {transform_indices = @transform_5, window_bounds = array<i64: 1, 1, 128>}, {transform_indices = @transform_6, window_bounds = array<i64: 1, 1, 128>}]} {
    %c0 = arith.constant 0 : index
    %c0_0 = arith.constant 0 : index
    %c0_1 = arith.constant 0 : index
    %0 = vector.load %arg2[%c0, %c0_0, %c0_1] : memref<1x8x128xf32, #tpu.memory_space<vmem>>, vector<1x8x128xf32>
    %1 = vector.shape_cast %0 : vector<1x8x128xf32> to vector<8x128xf32>
    %c0_2 = arith.constant 0 : index
    %c0_3 = arith.constant 0 : index
    %c0_4 = arith.constant 0 : index
    %2 = vector.load %arg3[%c0_2, %c0_3, %c0_4] : memref<1x8x128xf32, #tpu.memory_space<vmem>>, vector<1x8x128xf32>
    %3 = vector.shape_cast %2 : vector<1x8x128xf32> to vector<8x128xf32>
    %4 = math.absf %1 : vector<8x128xf32>
    %cst = arith.constant 0.000000e+00 : f32
    %5 = vector.broadcast %cst : f32 to vector<8x128xf32>
    %6 = arith.subf %5, %4 : vector<8x128xf32>
    %7 = math.exp %6 : vector<8x128xf32>
    %8 = math.log1p %7 : vector<8x128xf32>
    %cst_5 = arith.constant 1.000000e+00 : f32
    %9 = vector.broadcast %cst_5 : f32 to vector<8x128xf32>
    %10 = arith.addf %9, %7 : vector<8x128xf32>
    %cst_6 = arith.constant 1.000000e+00 : f32
    %11 = vector.broadcast %cst_6 : f32 to vector<8x128xf32>
    %12 = arith.divf %11, %10 : vector<8x128xf32>
    %cst_7 = arith.constant 0.000000e+00 : f32
    %13 = vector.broadcast %cst_7 : f32 to vector<8x128xf32>
    %14 = arith.cmpf oge, %1, %13 : vector<8x128xf32>
    %15 = arith.mulf %7, %12 : vector<8x128xf32>
    %16 = arith.select %14, %12, %15 : vector<8x128xi1>, vector<8x128xf32>
    %cst_8 = arith.constant 0.000000e+00 : f32
    %17 = vector.broadcast %cst_8 : f32 to vector<8x128xf32>
    %18 = arith.cmpf ogt, %3, %17 : vector<8x128xf32>
    %cst_9 = arith.constant 0.000000e+00 : f32
    %19 = vector.broadcast %cst_9 : f32 to vector<8x128xf32>
    %20 = arith.maximumf %1, %19 : vector<8x128xf32>
    %21 = arith.mulf %1, %3 : vector<8x128xf32>
    %22 = arith.subf %20, %21 : vector<8x128xf32>
    %23 = arith.addf %22, %8 : vector<8x128xf32>
    %cst_10 = arith.constant 1.000000e+00 : f32
    %24 = vector.broadcast %cst_10 : f32 to vector<8x128xf32>
    %25 = arith.subf %24, %16 : vector<8x128xf32>
    %26 = arith.select %18, %25, %16 : vector<8x128xi1>, vector<8x128xf32>
    %cst_11 = arith.constant 2.500000e-01 : f32
    %cst_12 = arith.constant 7.500000e-01 : f32
    %27 = vector.broadcast %cst_11 : f32 to vector<8x128xf32>
    %28 = vector.broadcast %cst_12 : f32 to vector<8x128xf32>
    %29 = arith.select %18, %27, %28 : vector<8x128xi1>, vector<8x128xf32>
    %30 = arith.mulf %29, %23 : vector<8x128xf32>
    %31 = arith.mulf %26, %26 : vector<8x128xf32>
    %32 = arith.mulf %30, %31 : vector<8x128xf32>
    %cst_13 = arith.constant 0.000000e+00 : f32
    %33 = vector.broadcast %cst_13 : f32 to vector<8x128xf32>
    %34 = arith.cmpf ogt, %1, %33 : vector<8x128xf32>
    %35 = arith.extui %34 : vector<8x128xi1> to vector<8x128xi32>
    %36 = arith.sitofp %35 : vector<8x128xi32> to vector<8x128xf32>
    %c0_i32 = arith.constant 0 : i32
    %37 = arith.cmpi eq, %arg1, %c0_i32 : i32
    %38 = arith.extui %37 : i1 to i32
    %c0_i32_14 = arith.constant 0 : i32
    %39 = arith.cmpi ne, %38, %c0_i32_14 : i32
    scf.if %39 {
      %cst_50 = arith.constant 0.000000e+00 : f32
      %74 = vector.broadcast %cst_50 : f32 to vector<1x1x128xf32>
      %c0_51 = arith.constant 0 : index
      %c0_52 = arith.constant 0 : index
      %c0_53 = arith.constant 0 : index
      %75 = vector.load %arg4[%c0_51, %c0_52, %c0_53] : memref<1x1x128xf32, #tpu.memory_space<vmem>>, vector<1x1x128xf32>
      tpu.vector_store %arg4[%c0_51, %c0_52, %c0_53], %74 {strides = array<i32>} : memref<1x1x128xf32, #tpu.memory_space<vmem>>, vector<1x1x128xf32>,
      %cst_54 = arith.constant 0.000000e+00 : f32
      %76 = vector.broadcast %cst_54 : f32 to vector<1x1x128xf32>
      %c0_55 = arith.constant 0 : index
      %c0_56 = arith.constant 0 : index
      %c0_57 = arith.constant 0 : index
      %77 = vector.load %arg5[%c0_55, %c0_56, %c0_57] : memref<1x1x128xf32, #tpu.memory_space<vmem>>, vector<1x1x128xf32>
      tpu.vector_store %arg5[%c0_55, %c0_56, %c0_57], %76 {strides = array<i32>} : memref<1x1x128xf32, #tpu.memory_space<vmem>>, vector<1x1x128xf32>,
      %cst_58 = arith.constant 0.000000e+00 : f32
      %78 = vector.broadcast %cst_58 : f32 to vector<1x1x128xf32>
      %c0_59 = arith.constant 0 : index
      %c0_60 = arith.constant 0 : index
      %c0_61 = arith.constant 0 : index
      %79 = vector.load %arg6[%c0_59, %c0_60, %c0_61] : memref<1x1x128xf32, #tpu.memory_space<vmem>>, vector<1x1x128xf32>
      tpu.vector_store %arg6[%c0_59, %c0_60, %c0_61], %78 {strides = array<i32>} : memref<1x1x128xf32, #tpu.memory_space<vmem>>, vector<1x1x128xf32>,
      %cst_62 = arith.constant 0.000000e+00 : f32
      %80 = vector.broadcast %cst_62 : f32 to vector<1x1x128xf32>
      %c0_63 = arith.constant 0 : index
      %c0_64 = arith.constant 0 : index
      %c0_65 = arith.constant 0 : index
      %81 = vector.load %arg7[%c0_63, %c0_64, %c0_65] : memref<1x1x128xf32, #tpu.memory_space<vmem>>, vector<1x1x128xf32>
      tpu.vector_store %arg7[%c0_63, %c0_64, %c0_65], %80 {strides = array<i32>} : memref<1x1x128xf32, #tpu.memory_space<vmem>>, vector<1x1x128xf32>,
      %cst_66 = arith.constant 0.000000e+00 : f32
      %82 = vector.broadcast %cst_66 : f32 to vector<1x1x128xf32>
      %c0_67 = arith.constant 0 : index
      %c0_68 = arith.constant 0 : index
      %c0_69 = arith.constant 0 : index
      %83 = vector.load %arg8[%c0_67, %c0_68, %c0_69] : memref<1x1x128xf32, #tpu.memory_space<vmem>>, vector<1x1x128xf32>
      tpu.vector_store %arg8[%c0_67, %c0_68, %c0_69], %82 {strides = array<i32>} : memref<1x1x128xf32, #tpu.memory_space<vmem>>, vector<1x1x128xf32>,
    } else {
    }
    %c0_15 = arith.constant 0 : index
    %c0_16 = arith.constant 0 : index
    %c0_17 = arith.constant 0 : index
    %40 = vector.load %arg4[%c0_15, %c0_16, %c0_17] : memref<1x1x128xf32, #tpu.memory_space<vmem>>, vector<1x1x128xf32>
    %cst_18 = arith.constant dense<0.000000e+00> : vector<128xf32>
    %41 = vector.multi_reduction <add>, %32, %cst_18 [0] : vector<8x128xf32> to vector<128xf32>
    %42 = vector.shape_cast %41 : vector<128xf32> to vector<1x128xf32>
    %43 = vector.shape_cast %42 : vector<1x128xf32> to vector<1x1x128xf32>
    %44 = arith.addf %40, %43 : vector<1x1x128xf32>
    %c0_19 = arith.constant 0 : index
    %c0_20 = arith.constant 0 : index
    %c0_21 = arith.constant 0 : index
    %45 = vector.load %arg4[%c0_19, %c0_20, %c0_21] : memref<1x1x128xf32, #tpu.memory_space<vmem>>, vector<1x1x128xf32>
    tpu.vector_store %arg4[%c0_19, %c0_20, %c0_21], %44 {strides = array<i32>} : memref<1x1x128xf32, #tpu.memory_space<vmem>>, vector<1x1x128xf32>,
    %c0_22 = arith.constant 0 : index
    %c0_23 = arith.constant 0 : index
    %c0_24 = arith.constant 0 : index
    %46 = vector.load %arg5[%c0_22, %c0_23, %c0_24] : memref<1x1x128xf32, #tpu.memory_space<vmem>>, vector<1x1x128xf32>
    %47 = arith.mulf %16, %3 : vector<8x128xf32>
    %cst_25 = arith.constant dense<0.000000e+00> : vector<128xf32>
    %48 = vector.multi_reduction <add>, %47, %cst_25 [0] : vector<8x128xf32> to vector<128xf32>
    %49 = vector.shape_cast %48 : vector<128xf32> to vector<1x128xf32>
    %50 = vector.shape_cast %49 : vector<1x128xf32> to vector<1x1x128xf32>
    %51 = arith.addf %46, %50 : vector<1x1x128xf32>
    %c0_26 = arith.constant 0 : index
    %c0_27 = arith.constant 0 : index
    %c0_28 = arith.constant 0 : index
    %52 = vector.load %arg5[%c0_26, %c0_27, %c0_28] : memref<1x1x128xf32, #tpu.memory_space<vmem>>, vector<1x1x128xf32>
    tpu.vector_store %arg5[%c0_26, %c0_27, %c0_28], %51 {strides = array<i32>} : memref<1x1x128xf32, #tpu.memory_space<vmem>>, vector<1x1x128xf32>,
    %c0_29 = arith.constant 0 : index
    %c0_30 = arith.constant 0 : index
    %c0_31 = arith.constant 0 : index
    %53 = vector.load %arg6[%c0_29, %c0_30, %c0_31] : memref<1x1x128xf32, #tpu.memory_space<vmem>>, vector<1x1x128xf32>
    %54 = arith.addf %16, %3 : vector<8x128xf32>
    %cst_32 = arith.constant dense<0.000000e+00> : vector<128xf32>
    %55 = vector.multi_reduction <add>, %54, %cst_32 [0] : vector<8x128xf32> to vector<128xf32>
    %56 = vector.shape_cast %55 : vector<128xf32> to vector<1x128xf32>
    %57 = vector.shape_cast %56 : vector<1x128xf32> to vector<1x1x128xf32>
    %58 = arith.addf %53, %57 : vector<1x1x128xf32>
    %c0_33 = arith.constant 0 : index
    %c0_34 = arith.constant 0 : index
    %c0_35 = arith.constant 0 : index
    %59 = vector.load %arg6[%c0_33, %c0_34, %c0_35] : memref<1x1x128xf32, #tpu.memory_space<vmem>>, vector<1x1x128xf32>
    tpu.vector_store %arg6[%c0_33, %c0_34, %c0_35], %58 {strides = array<i32>} : memref<1x1x128xf32, #tpu.memory_space<vmem>>, vector<1x1x128xf32>,
    %c0_36 = arith.constant 0 : index
    %c0_37 = arith.constant 0 : index
    %c0_38 = arith.constant 0 : index
    %60 = vector.load %arg7[%c0_36, %c0_37, %c0_38] : memref<1x1x128xf32, #tpu.memory_space<vmem>>, vector<1x1x128xf32>
    %61 = arith.mulf %36, %3 : vector<8x128xf32>
    %cst_39 = arith.constant dense<0.000000e+00> : vector<128xf32>
    %62 = vector.multi_reduction <add>, %61, %cst_39 [0] : vector<8x128xf32> to vector<128xf32>
    %63 = vector.shape_cast %62 : vector<128xf32> to vector<1x128xf32>
    %64 = vector.shape_cast %63 : vector<1x128xf32> to vector<1x1x128xf32>
    %65 = arith.addf %60, %64 : vector<1x1x128xf32>
    %c0_40 = arith.constant 0 : index
    %c0_41 = arith.constant 0 : index
    %c0_42 = arith.constant 0 : index
    %66 = vector.load %arg7[%c0_40, %c0_41, %c0_42] : memref<1x1x128xf32, #tpu.memory_space<vmem>>, vector<1x1x128xf32>
    tpu.vector_store %arg7[%c0_40, %c0_41, %c0_42], %65 {strides = array<i32>} : memref<1x1x128xf32, #tpu.memory_space<vmem>>, vector<1x1x128xf32>,
    %c0_43 = arith.constant 0 : index
    %c0_44 = arith.constant 0 : index
    %c0_45 = arith.constant 0 : index
    %67 = vector.load %arg8[%c0_43, %c0_44, %c0_45] : memref<1x1x128xf32, #tpu.memory_space<vmem>>, vector<1x1x128xf32>
    %68 = arith.maximumf %36, %3 : vector<8x128xf32>
    %cst_46 = arith.constant dense<0.000000e+00> : vector<128xf32>
    %69 = vector.multi_reduction <add>, %68, %cst_46 [0] : vector<8x128xf32> to vector<128xf32>
    %70 = vector.shape_cast %69 : vector<128xf32> to vector<1x128xf32>
    %71 = vector.shape_cast %70 : vector<1x128xf32> to vector<1x1x128xf32>
    %72 = arith.addf %67, %71 : vector<1x1x128xf32>
    %c0_47 = arith.constant 0 : index
    %c0_48 = arith.constant 0 : index
    %c0_49 = arith.constant 0 : index
    %73 = vector.load %arg8[%c0_47, %c0_48, %c0_49] : memref<1x1x128xf32, #tpu.memory_space<vmem>>, vector<1x1x128xf32>
    tpu.vector_store %arg8[%c0_47, %c0_48, %c0_49], %72 {strides = array<i32>} : memref<1x1x128xf32, #tpu.memory_space<vmem>>, vector<1x1x128xf32>,
    return
  }
  func.func @transform_0(%arg0: i32, %arg1: i32) -> (i32, i32, i32) {
    %c0_i32 = arith.constant 0 : i32
    %c0_i32_0 = arith.constant 0 : i32
    return %arg0, %arg1, %c0_i32 : i32, i32, i32
  }
  func.func @transform_1(%arg0: i32, %arg1: i32) -> (i32, i32, i32) {
    %c0_i32 = arith.constant 0 : i32
    %c0_i32_0 = arith.constant 0 : i32
    return %arg0, %arg1, %c0_i32 : i32, i32, i32
  }
  func.func @transform_2(%arg0: i32, %arg1: i32) -> (i32, i32, i32) {
    %c0_i32 = arith.constant 0 : i32
    %c0_i32_0 = arith.constant 0 : i32
    %c0_i32_1 = arith.constant 0 : i32
    return %arg0, %c0_i32, %c0_i32_0 : i32, i32, i32
  }
  func.func @transform_3(%arg0: i32, %arg1: i32) -> (i32, i32, i32) {
    %c0_i32 = arith.constant 0 : i32
    %c0_i32_0 = arith.constant 0 : i32
    %c0_i32_1 = arith.constant 0 : i32
    return %arg0, %c0_i32, %c0_i32_0 : i32, i32, i32
  }
  func.func @transform_4(%arg0: i32, %arg1: i32) -> (i32, i32, i32) {
    %c0_i32 = arith.constant 0 : i32
    %c0_i32_0 = arith.constant 0 : i32
    %c0_i32_1 = arith.constant 0 : i32
    return %arg0, %c0_i32, %c0_i32_0 : i32, i32, i32
  }
  func.func @transform_5(%arg0: i32, %arg1: i32) -> (i32, i32, i32) {
    %c0_i32 = arith.constant 0 : i32
    %c0_i32_0 = arith.constant 0 : i32
    %c0_i32_1 = arith.constant 0 : i32
    return %arg0, %c0_i32, %c0_i32_0 : i32, i32, i32
  }
  func.func @transform_6(%arg0: i32, %arg1: i32) -> (i32, i32, i32) {
    %c0_i32 = arith.constant 0 : i32
    %c0_i32_0 = arith.constant 0 : i32
    %c0_i32_1 = arith.constant 0 : i32
    return %arg0, %c0_i32, %c0_i32_0 : i32, i32, i32
  }
}

</mosaic_0001>

<bundles_post_ra>
// kernel: tpu_custom_call.1
= control target key start
LH: loop header
LB: loop body
LE: loop exit
PB: predicated region body
PF: predicated region fallthrough
CT: control target
= control target key end

     0   :  { %s1505_s0 = inlined_call_operand.hbm [shape: f32[2,8,128], index: 0, kind: input, shape index: {}]   ;;  %s1506_s1 = inlined_call_operand.hbm [shape: f32[2,8,128], index: 1, kind: input, shape index: {}]   ;;  %s1507_s2 = inlined_call_operand.hbm [shape: f32[2,1,128], index: 2, kind: output, shape index: {0}]   ;;  %s1508_s3 = inlined_call_operand.hbm [shape: f32[2,1,128], index: 3, kind: output, shape index: {1}]   ;;  %s1509_s4 = inlined_call_operand.hbm [shape: f32[2,1,128], index: 4, kind: output, shape index: {2}]   ;;  %s1510_s5 = inlined_call_operand.hbm [shape: f32[2,1,128], index: 5, kind: output, shape index: {3}]   ;;  %s1511_s6 = inlined_call_operand.hbm [shape: f32[2,1,128], index: 6, kind: output, shape index: {4}]  }
   0x1   :  { %1516 = sst [smem:[#allocation22_spill]] %s1505_s0 }
   0x2   :  { %1517 = sst [smem:[#allocation23_spill]] %s1506_s1 }
   0x3   :  { %12 = vsyncpa [#allocation3], 0 }
   0x4   :  { %14 = vsyncpa [#allocation3 + $0x1], 0 }
   0x5   :  { %15 = vsyncpa [#allocation6], 0 }
   0x6   :  { %17 = vsyncpa [#allocation6 + $0x1], 0 }
   0x7   :  { %18 = vsyncpa [#allocation4], 0 }
   0x8   :  { %20 = vsyncpa [#allocation4 + $0x1], 0 }
   0x9   :  { %21 = vsyncpa [#allocation9], 0 }
   0xa   :  { %23 = vsyncpa [#allocation9 + $0x1], 0 }
   0xb   :  { %24 = vsyncpa [#allocation12], 0 }
   0xc   :  { %26 = vsyncpa [#allocation12 + $0x1], 0  ;;  %s1143_s21 = smov 0   ;;  %s1145_s22 = smov 0  }
   0xd   :  { %s1147_s23 = smov 0   ;;  %s1149_s24 = smov 0  }
   0xe   :  { %s1151_s25 = smov 0   ;;  %s1153_s26 = smov 0  }
   0xf LB: > { %1518 = sst [smem:[#allocation19_spill]] %s1093_s25  ;;  %s1174_s27 = sadd.s32 4294967295, %s1097_s26   ;;  %s1097_s26 = sphi %s1153_s26, %s32_s26   ;;  %s1093_s25 = sphi %s1151_s25, %s1534_s25   ;;  %s1089_s24 = sphi %s1149_s24, %s1533_s24   ;;  %s1085_s23 = sphi %s1147_s23, %s1537_s23   ;;  %s1081_s22 = sphi %s1145_s22, %s1536_s22   ;;  %s1077_s21 = sphi %s1143_s21, %s1535_s21  }
  0x10   : > { %s1512_s28 = sadd.s32 4294967294, %s1097_s26   ;;  %s44_s29 = sadd.s32 1, %s1093_s25 }
  0x11   : > { %s53_s30 = sadd.s32 1, %s1085_s23  ;;  %p46_p0 = scmp.ge.s32.totalorder %s44_s29, 2 }
  0x12   : > { %p60_p1 = scmp.ne.s32.totalorder %s1085_s23, %s1081_s22  ;;  %p61_p2 = scmp.eq.s32.totalorder %s1097_s26, 0 }
  0x13   : > { %p66_p3 = scmp.ne.s32.totalorder %s1081_s22, %s1077_s21  ;;  %s1539_s29 = smov (%p46_p0, %s44_s29), 0 }
  0x14   : > { %1519 = sst [smem:[#allocation20_spill]] %s1539_s29  ;;  %p1186_p4 = por %p61_p2, %p60_p1 }
  0x15   : > { %p67_p5 = scmp.eq.s32.totalorder %s1174_s27, 0  ;;  %s48_s8 = ssub.s32 %s1093_s25, %s1539_s29 }
  0x16   : > { %p118_p6 = scmp.eq.s32.totalorder %s1174_s27, 1  ;;  %p51_p7 = scmp.eq.s32.totalorder %s48_s8, 0 }
  0x17   : > { %p1194_p8 = por %p67_p5, %p66_p3  ;;  %p124_p10 = scmp.eq.s32.totalorder %s1512_s28, 1 }
  0x18   : > { %p1198_p9 = por %p118_p6, %p60_p1  ;;  %p787_p13 = scmp.lt.s32.totalorder %s1097_s26, 2 }
  0x19   : > { %s1205_s11 = scalar_select %p51_p7, %s1085_s23, %s53_s30  }
  0x1a   : > { %p1207_p11 = por %p124_p10, %p66_p3  ;;  %s1214_s13 = sand.u32 1, %s1085_s23  }
  0x1b   : > { %1523 = sst [smem:[#allocation21_spill]] %s1205_s11  ;;  %s735_s14 = sshll.u32 %s1214_s13, 3 }
  0x1c   : > { %s736_s15 = sshll.u32 %s1093_s25, 7  ;;  %s1525_s0 = sld [smem:[#allocation22_spill]] }
  0x1d   : > { %s252_s19 = scalar_lea.vmem [#allocation2], %s735_s14  ;;  %p1223_p0 = pnand %p787_p13, %p1186_p4 }
  0x1e   : > { %s260_s20 = sshll.u32 %s252_s19, 4  ;;  %p739_p1 = scmp.ge.s32.totalorder %s1097_s26, 1  ;;  %s261_s20 = int_to_ptr.vmem [resolvable:$true] %s260_s20 }
  0x1f   : > { %p284_p2 = scmp.lt.s32.totalorder %s1097_s26, 3  ;;  %s249_s8 = scalar_lea.sflag [#allocation3], %s1214_s13 }
  0x20   : > { %p847_p3 = pneg %p1223_p0  ;;  %s858_s28 = scalar_lea.vmem %s261_s20, 128 }
  0x21   : > { %p859_p5 = scmp.ne.s32.totalorder %s261_s20, %s858_s28  ;;  %s1099_s16 = smov [#allocation2]  }
  0x22   : > { %s258_s18 = scalar_lea.hbm %s1525_s0, %s736_s15  ;;  %s863_s17 = sshll.u32 %s1099_s16, 4  ;;  %s864_s17 = int_to_ptr.vmem [resolvable:$false] %s863_s17 }
  0x23   : > { %p861_p6 = pnand %p859_p5, %p847_p3  ;;  %s865_s7 = scalar_lea.vmem %s864_s17, 256 }
  0x24   : > { %p866_p4 = scmp.lt.s32.totalorder %s261_s20, %s864_s17  ;;  %p867_p10 = scmp.lt.s32.totalorder %s865_s7, %s858_s28 }
  0x25   : > { %p862_p7 = pneg %p861_p6 }
  0x26   : > { %p868_p13 = por %p867_p10, %p866_p4 }
  0x28   : > { %p869_p12 = pnand %p868_p13, %p862_p7 }
  0x2a   : > { %872 = shalt.err (!%p869_p12)
}
  0x2b   : > { %767 = dma.hbm_to_vmem [thread:$0]  (!%p1223_p0), %s258_s18, 128, %s261_s20, %s249_s8  }
  0x2c   : > { %p1241_p5 = pnand %p739_p1, %p284_p2  ;;  %s1528_s1 = sld [smem:[#allocation23_spill]] }
  0x2d   : > { %s271_s17 = scalar_lea.vmem [#allocation5], %s735_s14  ;;  %s268_s29 = scalar_lea.sflag [#allocation6], %s1214_s13 }
  0x2e   : > { %s279_s7 = sshll.u32 %s271_s17, 4  ;;  %s1100_s18 = smov [#allocation5]   ;;  %s280_s7 = int_to_ptr.vmem [resolvable:$true] %s279_s7 }
  0x2f   : > { %s886_s25 = scalar_lea.vmem %s280_s7, 128  ;;  %s891_s20 = sshll.u32 %s1100_s18, 4  ;;  %s892_s20 = int_to_ptr.vmem [resolvable:$false] %s891_s20 }
  0x30   : > { %p887_p12 = scmp.ne.s32.totalorder %s280_s7, %s886_s25  ;;  %s893_s8 = scalar_lea.vmem %s892_s20, 256 }
  0x31   : > { %p894_p1 = scmp.lt.s32.totalorder %s280_s7, %s892_s20  ;;  %p895_p2 = scmp.lt.s32.totalorder %s893_s8, %s886_s25 }
  0x32   : > { %s277_s28 = scalar_lea.hbm %s1528_s1, %s736_s15  ;;  %p889_p6 = pnand %p887_p12, %p847_p3 }
  0x33   : > { %p896_p4 = por %p895_p2, %p894_p1 }
  0x34   : > { %p890_p7 = pneg %p889_p6 }
  0x36   : > { %p897_p10 = pnand %p896_p4, %p890_p7 }
  0x38   : > { %900 = shalt.err (!%p897_p10)
}
  0x39   : > { %770 = dma.hbm_to_vmem [thread:$0]  (!%p1223_p0), %s277_s28, 128, %s280_s7, %s268_s29  }
  0x3a   : > { %288 = sbr.rel (%p1241_p5) target bundleno = 214 (0xd6), region = 28  ;;  %s1257_s0 = sand.u32 (!%p1241_p5), 1, %s1081_s22  }
  0x3b   : > { %s740_s13 = sshll.u32 (!%p1241_p5), %s1257_s0, 3  ;;  %s291_s14 = scalar_lea.sflag (!%p1241_p5), [#allocation3], %s1257_s0 }
  0x3c   : > { %s294_s15 = scalar_lea.vmem (!%p1241_p5), [#allocation2], %s740_s13 }
  0x3f   : > { %1056 = dma.done.wait (%p1194_p8), %s291_s14, 128  }
  0x40   : > { %1058 = vsyncadd (%p1194_p8), %s291_s14, 4294967168  ;;  %s300_s25 = scalar_lea.sflag [#allocation6], %s1257_s0  ;;  %s303_s29 = scalar_lea.vmem [#allocation5], %s740_s13 }
  0x41   : > { %1060 = dma.done.wait (%p1194_p8), %s300_s25, 128  }
  0x42   : > { %1062 = vsyncadd (%p1194_p8), %s300_s25, 4294967168  ;;  %s1271_s30 = scalar_lea.vmem [#allocation8], %s1257_s0  ;;  %v1101_v0 = vmov 0.0   ;;  %s1275_s19 = scalar_lea.vmem [#allocation11], %s1257_s0  ;;  %v1290_v1 = vld [vmem:[%s294_s15] sm:$0xff]  ;;  %v1294_v3 = vld [vmem:[%s303_s29] sm:$0xff] }
  0x43   : > { %392 = vst [vmem:[%s1271_s30] sm:$0x1] %v1101_v0  ;;  %394 = vst [vmem:[%s1275_s19] sm:$0x1] %v1101_v0  ;;  %s1279_s16 = scalar_lea.vmem [#allocation7], %s1257_s0  ;;  %s1283_s9 = scalar_lea.vmem [#allocation10], %s1257_s0  ;;  %v354_v2 = vand.u32 2147483647, %v1290_v1 }
  0x44   : > { %391 = vst [vmem:[%s1279_s16] sm:$0x1] %v1101_v0  ;;  %393 = vst [vmem:[%s1283_s9] sm:$0x1] %v1101_v0  ;;  %s1287_s28 = scalar_lea.vmem [#allocation13], %s1257_s0  ;;  %vm384_vm0 = vcmp.gt.f32.partialorder %v1290_v1, 0.0  ;;  %s1515_s17 = sand.u32 1, %s1174_s27  }
  0x45   : > { %395 = vst [vmem:[%s1287_s28] sm:$0x1] %v1101_v0  ;;  %v742_v4 = vsel %vm384_vm0, 1.0, %v1101_v0  ;;  %v355_v5 = vsub.f32 0.0, %v354_v2  ;;  %s1302_s7 = sshll.u32 %s1089_s24, 4  ;;  %s513_s18 = sshll.u32 %s1275_s19, 4  ;;  %s1312_s18 = int_to_ptr.vmem [resolvable:$true] %s513_s18 }
  0x46   : > { %v426_v6 = vmul.f32 %v742_v4, %v1294_v3  ;;  %v436_v7 = vmax.f32 %v742_v4, %v1294_v3  ;;  %s526_s20 = sshll.u32 %s1287_s28, 4  ;;  %s1310_s14 = scalar_lea.hbm %s1510_s5, %s1302_s7  ;;  %s1314_s20 = int_to_ptr.vmem [resolvable:$true] %s526_s20 }
  0x47   : > { %v356_v8 = vmul.f32 1.442695, %v355_v5  ;;  %s1320_s25 = scalar_lea.hbm %s1511_s6, %s1302_s7  ;;  %s1328_s29 = scalar_lea.sflag [#allocation12], %s1515_s17 }
  0x48   : > { %v427_v9 = vrot.slane %v426_v6, 4  ;;  %v437_v10 = vrot.slane %v436_v7, 4  ;;  %s901_s8 = scalar_lea.vmem %s1312_s18, 16  ;;  %s1102_s13 = smov [#allocation11]  }
  0x49   : > { %839 = vpow2.f32 %v356_v8  ;;  %p902_p8 = scmp.ne.s32.totalorder %s1312_s18, %s901_s8  ;;  %s905_s1 = sshll.u32 %s1102_s13, 4  ;;  %s906_s1 = int_to_ptr.vmem [resolvable:$false] %s905_s1 }
  0x4a   : > { %v428_v11 = vadd.f32 %v427_v9, %v426_v6  ;;  %v438_v12 = vadd.f32 %v437_v10, %v436_v7  ;;  %v425_v19 = vld [vmem:[%s1275_s19] sm:$0x1]  ;;  %s907_s11 = scalar_lea.vmem %s906_s1, 32  ;;  %p908_p13 = scmp.lt.s32.totalorder %s1312_s18, %s906_s1 }
  0x4b   : > { %p903_p0 = pnand %p902_p8, %p1198_p9  ;;  %p909_p5 = scmp.lt.s32.totalorder %s907_s11, %s901_s8 }
  0x4c   : > { %v429_v13 = vrot.slane %v428_v11, 2  ;;  %v439_v14 = vrot.slane %v438_v12, 2  ;;  %v435_v20 = vld [vmem:[%s1287_s28] sm:$0x1] }
  0x4d   : > { %p904_p3 = pneg %p903_p0  ;;  %p910_p12 = por %p909_p5, %p908_p13 }
  0x4e   : > { %v430_v15 = vadd.f32 %v429_v13, %v428_v11  ;;  %v440_v16 = vadd.f32 %v439_v14, %v438_v12 }
  0x4f   : > { %p911_p6 = pnand %p910_p12, %p904_p3 }
  0x50   : > { %v431_v17 = vrot.slane %v430_v15, 1  ;;  %v441_v18 = vrot.slane %v440_v16, 1 }
  0x52   : > { %v432_v21 = vadd.f32 %v431_v17, %v430_v15  ;;  %v442_v22 = vadd.f32 %v441_v18, %v440_v16 }
  0x54   : > { %v433_v23 = vadd.f32 %v432_v21, %v425_v19  ;;  %v443_v24 = vadd.f32 %v442_v22, %v435_v20 }
  0x56   : > { %434 = vst [vmem:[%s1275_s19] sm:$0x1] %v433_v23  ;;  %444 = vst [vmem:[%s1287_s28] sm:$0x1] %v443_v24  ;;  %v1324_v25 = vpop.eup %839 }
  0x57   : > { %914 = shalt.err (!%p911_p6)
}
  0x58   : > { %s915_s19 = scalar_lea.hbm %s1310_s14, 16  ;;  %s919_s15 = scalar_lea.hbm %s1510_s5, 32 }
  0x59   : > { %p916_p7 = scmp.ne.s32.totalorder %s1310_s14, %s915_s19  ;;  %p920_p4 = scmp.lt.s32.totalorder %s1310_s14, %s1510_s5 }
  0x5a   : > { %p921_p10 = scmp.lt.s32.totalorder %s919_s15, %s915_s19 }
  0x5b   : > { %p917_p1 = pnand %p916_p7, %p1198_p9 }
  0x5c   : > { %p922_p8 = por %p921_p10, %p920_p4 }
  0x5d   : > { %p918_p2 = pneg %p917_p1 }
  0x5f   : > { %p923_p0 = pnand %p922_p8, %p918_p2 }
  0x61   : > { %926 = shalt.err (!%p923_p0)
}
  0x62   : > { %757 = dma.vmem_to_hbm [thread:$0]  (%p1198_p9), %s1312_s18, 16, %s1310_s14, %s1328_s29   ;;  %v358_v26 = vadd.f32 1.0, %v1324_v25 }
  0x63   : > { %s927_s1 = scalar_lea.vmem %s1314_s20, 16  ;;  %s1103_s11 = smov [#allocation13]  }
  0x64   : > { %p928_p3 = scmp.ne.s32.totalorder %s1314_s20, %s927_s1  ;;  %s931_s17 = sshll.u32 %s1103_s11, 4  ;;  %s932_s17 = int_to_ptr.vmem [resolvable:$false] %s931_s17 }
  0x65   : > { %s933_s8 = scalar_lea.vmem %s932_s17, 32  ;;  %p934_p12 = scmp.lt.s32.totalorder %s1314_s20, %s932_s17 }
  0x66   : > { %p929_p13 = pnand %p928_p3, %p1198_p9  ;;  %p935_p6 = scmp.lt.s32.totalorder %s933_s8, %s927_s1 }
  0x68   : > { %p930_p5 = pneg %p929_p13  ;;  %p936_p7 = por %p935_p6, %p934_p12 }
  0x6a   : > { %p937_p1 = pnand %p936_p7, %p930_p5 }
  0x6c   : > { %940 = shalt.err (!%p937_p1)
}
  0x6d   : > { %s941_s18 = scalar_lea.hbm %s1320_s25, 16  ;;  %s945_s28 = scalar_lea.hbm %s1511_s6, 32 }
  0x6e   : > { %p942_p2 = scmp.ne.s32.totalorder %s1320_s25, %s941_s18  ;;  %p946_p8 = scmp.lt.s32.totalorder %s1320_s25, %s1511_s6 }
  0x6f   : > { %p947_p0 = scmp.lt.s32.totalorder %s945_s28, %s941_s18 }
  0x70   : > { %p943_p4 = pnand %p942_p2, %p1198_p9 }
  0x71   : > { %p948_p3 = por %p947_p0, %p946_p8 }
  0x72   : > { %p944_p10 = pneg %p943_p4 }
  0x74   : > { %p949_p13 = pnand %p948_p3, %p944_p10 }
  0x76   : > { %952 = shalt.err (!%p949_p13)
}
  0x77   : > { %758 = dma.vmem_to_hbm [thread:$0]  (%p1198_p9), %s1314_s20, 16, %s1320_s25, %s1328_s29   ;;  %841 = vrcp.f32 %v358_v26  ;;  %v361_v27 = vmul.f32 -0.5, %v1324_v25  ;;  %v364_v29 = vand.u32 2147483647, %v1324_v25  ;;  %v374_v30 = vmax.f32 %v1290_v1, 0.0 }
  0x78   : > { %843 = vlog2.f32 %v358_v26  ;;  %v375_v31 = vmul.f32 %v1294_v3, %v1290_v1  ;;  %vm370_vm1 = vcmp.ge.f32.partialorder %v1290_v1, 0.0  ;;  %vm373_vm2 = vcmp.gt.f32.partialorder %v1294_v3, 0.0  ;;  %v405_v62 = vld [vmem:[%s1271_s30] sm:$0x1]  ;;  %s487_s20 = sshll.u32 %s1271_s30, 4  ;;  %s500_s25 = sshll.u32 %s1283_s9, 4  ;;  %s1394_s20 = int_to_ptr.vmem [resolvable:$true] %s487_s20  ;;  %s1396_s25 = int_to_ptr.vmem [resolvable:$true] %s500_s25 }
  0x79   : > { %v362_v28 = vadd.f32 1.0, %v361_v27  ;;  %vm365_vm3 = vcmp.lt.f32.partialorder %v364_v29, 0.0004427343  ;;  %v1104_v39 = vmov 0.75   ;;  %v415_v0 = vld [vmem:[%s1283_s9] sm:$0x1]  ;;  %s1392_s1 = scalar_lea.hbm %s1508_s3, %s1302_s7  ;;  %s1402_s8 = scalar_lea.hbm %s1509_s4, %s1302_s7 }
  0x7a   : > { %v376_v36 = vsub.f32 %v374_v30, %v375_v31  ;;  %v380_v40 = vsel %vm373_vm2, 0.25, %v1104_v39  ;;  %v396_v7 = vld [vmem:[%s1279_s16] sm:$0x1]  ;;  %s1411_s19 = scalar_lea.hbm %s1507_s2, %s1302_s7  ;;  %s474_s28 = sshll.u32 %s1279_s16, 4  ;;  %s475_s28 = int_to_ptr.vmem [resolvable:$true] %s474_s28 }
  0x7b   : > { %v363_v33 = vmul.f32 %v1324_v25, %v362_v28  ;;  %s1529_s24 = sand.u32 1, %s1174_s27   ;;  %s953_s29 = scalar_lea.vmem %s1394_s20, 16 }
  0x7c   : > { %s1416_s15 = scalar_lea.sflag [#allocation9], %s1529_s24  ;;  %p954_p5 = scmp.ne.s32.totalorder %s1394_s20, %s953_s29 }
  0x7d   : > { %s1105_s13 = smov [#allocation8]  }
  0x7e   : > { %p955_p12 = pnand %p954_p5, %p1198_p9  ;;  %s957_s11 = sshll.u32 %s1105_s13, 4  ;;  %s958_s11 = int_to_ptr.vmem [resolvable:$false] %s957_s11 }
  0x7f   : > { %p960_p7 = scmp.lt.s32.totalorder %s1394_s20, %s958_s11 }
  0x80   : > { %p956_p6 = pneg %p955_p12 }
  0x84   : > { %v842_v32 = vpop.eup %841 }
  0x85   : > { %v844_v34 = vpop.eup %843  ;;  %v371_v35 = vmul.f32 %v842_v32, %v1324_v25 }
  0x86   : > { %v360_v37 = vmul.f32 0.6931472, %v844_v34 }
  0x87   : > { %v372_v38 = vsel %vm370_vm1, %v842_v32, %v371_v35 }
  0x88   : > { %v406_v41 = vmul.f32 %v372_v38, %v1294_v3  ;;  %v366_v42 = vsel %vm365_vm3, %v363_v33, %v360_v37  ;;  %v378_v43 = vsub.f32 1.0, %v372_v38  ;;  %v416_v44 = vadd.f32 %v372_v38, %v1294_v3 }
  0x89   : > { %v377_v45 = vadd.f32 %v376_v36, %v366_v42 }
  0x8a   : > { %v407_v46 = vrot.slane %v406_v41, 4  ;;  %v379_v47 = vsel %vm373_vm2, %v378_v43, %v372_v38  ;;  %v417_v48 = vrot.slane %v416_v44, 4 }
  0x8b   : > { %v381_v49 = vmul.f32 %v380_v40, %v377_v45  ;;  %v382_v50 = vmul.f32 %v379_v47, %v379_v47 }
  0x8c   : > { %v408_v51 = vadd.f32 %v407_v46, %v406_v41  ;;  %v418_v52 = vadd.f32 %v417_v48, %v416_v44 }
  0x8d   : > { %v383_v53 = vmul.f32 %v382_v50, %v381_v49 }
  0x8e   : > { %v409_v54 = vrot.slane %v408_v51, 2  ;;  %v419_v55 = vrot.slane %v418_v52, 2 }
  0x8f   : > { %v397_v56 = vrot.slane %v383_v53, 4 }
  0x90   : > { %v410_v57 = vadd.f32 %v409_v54, %v408_v51  ;;  %v420_v58 = vadd.f32 %v419_v55, %v418_v52 }
  0x91   : > { %v398_v59 = vadd.f32 %v397_v56, %v383_v53 }
  0x92   : > { %v411_v60 = vrot.slane %v410_v57, 1  ;;  %v421_v61 = vrot.slane %v420_v58, 1 }
  0x93   : > { %v399_v63 = vrot.slane %v398_v59, 2 }
  0x94   : > { %v412_v1 = vadd.f32 %v411_v60, %v410_v57  ;;  %v422_v2 = vadd.f32 %v421_v61, %v420_v58 }
  0x95   : > { %v400_v3 = vadd.f32 %v399_v63, %v398_v59 }
  0x96   : > { %v413_v4 = vadd.f32 %v412_v1, %v405_v62  ;;  %v423_v5 = vadd.f32 %v422_v2, %v415_v0 }
  0x97   : > { %v401_v6 = vrot.slane %v400_v3, 1 }
  0x98   : > { %414 = vst [vmem:[%s1271_s30] sm:$0x1] %v413_v4  ;;  %424 = vst [vmem:[%s1283_s9] sm:$0x1] %v423_v5  ;;  %s959_s30 = scalar_lea.vmem %s958_s11, 32 }
  0x99   : > { %v402_v8 = vadd.f32 %v401_v6, %v400_v3  ;;  %p961_p1 = scmp.lt.s32.totalorder %s959_s30, %s953_s29 }
  0x9b   : > { %p962_p2 = por %p961_p1, %p960_p7 }
  0x9d   : > { %p963_p4 = pnand %p962_p2, %p956_p6 }
  0x9f   : > { %966 = shalt.err (!%p963_p4)
}
  0xa0   : > { %s967_s27 = scalar_lea.hbm %s1392_s1, 16  ;;  %s971_s17 = scalar_lea.hbm %s1508_s3, 32 }
  0xa1   : > { %p968_p10 = scmp.ne.s32.totalorder %s1392_s1, %s967_s27  ;;  %p972_p3 = scmp.lt.s32.totalorder %s1392_s1, %s1508_s3 }
  0xa2   : > { %p973_p13 = scmp.lt.s32.totalorder %s971_s17, %s967_s27 }
  0xa3   : > { %p969_p8 = pnand %p968_p10, %p1198_p9 }
  0xa4   : > { %p974_p5 = por %p973_p13, %p972_p3 }
  0xa5   : > { %p970_p0 = pneg %p969_p8 }
  0xa7   : > { %p975_p12 = pnand %p974_p5, %p970_p0 }
  0xa9   : > { %978 = shalt.err (!%p975_p12)
}
  0xaa   : > { %755 = dma.vmem_to_hbm [thread:$0]  (%p1198_p9), %s1394_s20, 16, %s1392_s1, %s1416_s15  }
  0xab   : > { %s979_s24 = scalar_lea.vmem %s1396_s25, 16  ;;  %s1106_s29 = smov [#allocation10]  }
  0xac   : > { %p980_p6 = scmp.ne.s32.totalorder %s1396_s25, %s979_s24  ;;  %s983_s13 = sshll.u32 %s1106_s29, 4  ;;  %s984_s13 = int_to_ptr.vmem [resolvable:$false] %s983_s13 }
  0xad   : > { %s985_s11 = scalar_lea.vmem %s984_s13, 32  ;;  %p986_p2 = scmp.lt.s32.totalorder %s1396_s25, %s984_s13 }
  0xae   : > { %p981_p7 = pnand %p980_p6, %p1198_p9  ;;  %p987_p4 = scmp.lt.s32.totalorder %s985_s11, %s979_s24 }
  0xb0   : > { %p982_p1 = pneg %p981_p7  ;;  %p988_p10 = por %p987_p4, %p986_p2 }
  0xb2   : > { %p989_p8 = pnand %p988_p10, %p982_p1 }
  0xb4   : > { %992 = shalt.err (!%p989_p8)
}
  0xb5   : > { %s993_s30 = scalar_lea.hbm %s1402_s8, 16  ;;  %s997_s27 = scalar_lea.hbm %s1509_s4, 32 }
  0xb6   : > { %p994_p0 = scmp.ne.s32.totalorder %s1402_s8, %s993_s30  ;;  %p998_p5 = scmp.lt.s32.totalorder %s1402_s8, %s1509_s4 }
  0xb7   : > { %p999_p12 = scmp.lt.s32.totalorder %s997_s27, %s993_s30 }
  0xb8   : > { %p995_p3 = pnand %p994_p0, %p1198_p9 }
  0xb9   : > { %p1000_p6 = por %p999_p12, %p998_p5 }
  0xba   : > { %p996_p13 = pneg %p995_p3 }
  0xbc   : > { %p1001_p7 = pnand %p1000_p6, %p996_p13 }
  0xbe   : > { %1004 = shalt.err (!%p1001_p7)
}
  0xbf   : > { %756 = dma.vmem_to_hbm [thread:$0]  (%p1198_p9), %s1396_s25, 16, %s1402_s8, %s1416_s15   ;;  %v403_v9 = vadd.f32 %v402_v8, %v396_v7 }
  0xc0   : > { %s446_s17 = scalar_lea.sflag [#allocation4], %s1257_s0  ;;  %s1005_s18 = scalar_lea.vmem %s475_s28, 16 }
  0xc1   : > { %404 = vst [vmem:[%s1279_s16] sm:$0x1] %v403_v9  ;;  %p1006_p1 = scmp.ne.s32.totalorder %s475_s28, %s1005_s18  ;;  %s1107_s14 = smov [#allocation7]  }
  0xc2   : > { %s1009_s24 = sshll.u32 %s1107_s14, 4  ;;  %s1010_s24 = int_to_ptr.vmem [resolvable:$false] %s1009_s24 }
  0xc3   : > { %p1007_p2 = pnand %p1006_p1, %p1198_p9  ;;  %s1011_s29 = scalar_lea.vmem %s1010_s24, 32 }
  0xc4   : > { %p1012_p10 = scmp.lt.s32.totalorder %s475_s28, %s1010_s24  ;;  %p1013_p8 = scmp.lt.s32.totalorder %s1011_s29, %s1005_s18 }
  0xc5   : > { %p1008_p4 = pneg %p1007_p2 }
  0xc6   : > { %p1014_p0 = por %p1013_p8, %p1012_p10 }
  0xc8   : > { %p1015_p3 = pnand %p1014_p0, %p1008_p4 }
  0xca   : > { %1018 = shalt.err (!%p1015_p3)
}
  0xcb   : > { %s1019_s16 = scalar_lea.hbm %s1411_s19, 16  ;;  %s1023_s8 = scalar_lea.hbm %s1507_s2, 32 }
  0xcc   : > { %p1020_p13 = scmp.ne.s32.totalorder %s1411_s19, %s1019_s16  ;;  %p1024_p6 = scmp.lt.s32.totalorder %s1411_s19, %s1507_s2 }
  0xcd   : > { %p1025_p7 = scmp.lt.s32.totalorder %s1023_s8, %s1019_s16 }
  0xce   : > { %p1021_p5 = pnand %p1020_p13, %p1198_p9 }
  0xcf   : > { %p1026_p1 = por %p1025_p7, %p1024_p6 }
  0xd0   : > { %p1022_p12 = pneg %p1021_p5 }
  0xd2   : > { %p1027_p2 = pnand %p1026_p1, %p1022_p12 }
  0xd4   : > { %1030 = shalt.err (!%p1027_p2)
}
  0xd5   : > { %754 = dma.vmem_to_hbm [thread:$0]  (%p1198_p9), %s475_s28, 16, %s1411_s19, %s446_s17  }
  0xd6 PF: > { %s538_s11 = sand.u32 1, %s1077_s21   ;;  %p1530_p4 = scmp.ge.s32.totalorder %s1097_s26, 2 }
  0xd7   : > { %s539_s30 = scalar_lea.sflag [#allocation4], %s538_s11 }
  0xd8   : > { %p772_p10 = pnand %p1530_p4, %p1207_p11 }
  0xda   : > { %p773_p8 = pneg %p772_p10 }
  0xdc   : > { %1064 = dma.done.wait (%p773_p8), %s539_s30, 16  }
  0xdd   : > { %1066 = vsyncadd (%p773_p8), %s539_s30, 4294967280  ;;  %s1531_s20 = sadd.s32 4294967294, %s1097_s26  }
  0xde   : > { %s546_s1 = sand.u32 1, %s1531_s20  }
  0xdf   : > { %s547_s27 = scalar_lea.sflag [#allocation9], %s546_s1 }
  0xe0   : > { %1068 = dma.done.wait (%p773_p8), %s547_s27, 32  }
  0xe1   : > { %1070 = vsyncadd (%p773_p8), %s547_s27, 4294967264  ;;  %s563_s10 = scalar_lea.sflag [#allocation12], %s546_s1 }
  0xe2   : > { %1072 = dma.done.wait (%p773_p8), %s563_s10, 32  }
  0xe3   : > { %1074 = vsyncadd (%p773_p8), %s563_s10, 4294967264  ;;  %s32_s26 = sadd.s32 1, %s1097_s26   ;;  %s1532_s12 = sld [smem:[#allocation21_spill]] }
  0xe4   : > { %p29_p9 = scmp.ge.s32.totalorder %s32_s26, 4   ;;  %s1533_s24 = sld [smem:[#allocation19_spill]] }
  0xe5   : > { %s1534_s25 = sld [smem:[#allocation20_spill]]  ;;  %s1535_s21 = smov %s1081_s22 }
  0xe6   : > { %s1536_s22 = smov %s1085_s23  ;;  %31 = sbr.rel (!%p29_p9) target bundleno = 15 (0xf), region = 154 }
  0xe9   : > { %s1537_s23 = smov %s1532_s12 }
  0xeb   :  { %575 = vsyncpa [#allocation3], 1 }
  0xec   :  { %577 = vsyncpa [#allocation3 + $0x1], 1 }
  0xed   :  { %578 = vsyncpa [#allocation6], 1 }
  0xee   :  { %580 = vsyncpa [#allocation6 + $0x1], 1 }
  0xef   :  { %581 = vsyncpa [#allocation4], 1 }
  0xf0   :  { %583 = vsyncpa [#allocation4 + $0x1], 1 }
  0xf1   :  { %584 = vsyncpa [#allocation9], 1 }
  0xf2   :  { %586 = vsyncpa [#allocation9 + $0x1], 1 }
  0xf3   :  { %587 = vsyncpa [#allocation12], 1 }
  0xf4   :  { %589 = vsyncpa [#allocation12 + $0x1], 1 }

</bundles_post_ra>
